<compile_context>
chip_gen: v6e
topology: v6e:2x2x1
jax: 0.10.0
libtpu: 0.0.40
codegen_flags: <defaults>
</compile_context>

<pallas_src>
import math

import jax
import jax.numpy as jnp
from jax import lax
from jax.experimental import pallas as pl
from jax.experimental.pallas import tpu as pltpu


def _round_up(x: int, m: int) -> int:
    return (x + m - 1) // m * m


def _cdiv(a: int, b: int) -> int:
    return (a + b - 1) // b


def _vmem_limit(need_bytes: int) -> int:
    # >= 32 MiB (comfortably above v5e's 16 MiB scoped default), <= 48 MiB
    # (safe under v7x's 64 MiB physical VMEM).
    return int(min(max(2 * need_bytes, 32 * 1024 * 1024), 48 * 1024 * 1024))


# ---------------------------------------------------------------------------
# Kernel 1: support = X @ W   (tiled over rows of X, W resident)
# ---------------------------------------------------------------------------
def _support_kernel(x_ref, w_ref, s_ref):
    s_ref[...] = jnp.dot(
        x_ref[...], w_ref[...], preferred_element_type=jnp.float32
    ).astype(s_ref.dtype)


# ---------------------------------------------------------------------------
# Kernel 2: out = adj @ support (+ bias)
# grid = (row tiles, reduction tiles over adj columns); f32 accumulator in
# VMEM, bias added only on the last reduction step.
# ---------------------------------------------------------------------------
def _make_aggregate_kernel(n, tk, num_k, mask_tail, slice_support, has_bias):
    def kernel(adj_ref, s_ref, *rest):
        if has_bias:
            b_ref, o_ref, acc_ref = rest
        else:
            o_ref, acc_ref = rest

        k = pl.program_id(1)

        @pl.when(k == 0)
        def _():
            acc_ref[...] = jnp.zeros_like(acc_ref)

        a = adj_ref[...]
        if mask_tail:
            # Last reduction tile is a partial edge block of the un-padded adj:
            # zero the out-of-bounds columns (their contents are unspecified).
            col = k * tk + lax.broadcasted_iota(jnp.int32, a.shape, 1)
            a = jnp.where(col < n, a, jnp.zeros_like(a))

        if slice_support:
            # support is fully VMEM-resident; take the k-th row slab.
            off = pl.multiple_of(k * tk, tk)
            s = s_ref[pl.ds(off, tk), :]
        else:
            s = s_ref[...]

        acc_ref[...] += jnp.dot(a, s, preferred_element_type=jnp.float32)

        @pl.when(k == num_k - 1)
        def _():
            r = acc_ref[...]
            if has_bias:
                r = r + b_ref[...]
            o_ref[...] = r.astype(o_ref.dtype)

    return kernel


def gcn_layer(x, adj, weight, bias=None, *, compute_dtype=jnp.bfloat16):
    """Fused GCN layer: adj @ (x @ weight) (+ bias).

    x:      [N, in_f]       float32
    adj:    [N, N]
    weight: [in_f, out_f]   float32
    bias:   [out_f] or None
    returns [N, out_f]      x.dtype (accumulation is always f32)
    """
    n, in_f = x.shape
    assert adj.shape == (n, n)
    out_f = weight.shape[1]
    out_dtype = x.dtype
    cdt = jnp.dtype(compute_dtype)
    itm = cdt.itemsize

    # ---- geometry -----------------------------------------------------------
    out_f_pad = _round_up(out_f, 128)          # lane-dense output features
    in_f_pad = _round_up(in_f, 128)            # aligned MXU K for X @ W

    if cdt == jnp.dtype(jnp.bfloat16):
        tm_max, tk_max = 1024, 2048
    else:
        tm_max, tk_max = 512, 1024

    # Block dims must be multiples of (8, 128) OR equal the full array dims.
    tm = n if n <= tm_max else tm_max          # adj / output row tile
    tk = n if n <= tk_max else tk_max          # reduction tile (adj cols)
    num_i = _cdiv(n, tm)
    num_k = _cdiv(n, tk)
    n_sup_pad = num_k * tk                     # support row extent (zero-padded)

    mask_tail = (num_k > 1) and (n % tk != 0)  # partial last reduction tile

    support_bytes = n_sup_pad * out_f_pad * itm
    support_resident = support_bytes <= 4 * 1024 * 1024
    slice_support = support_resident and num_k > 1

    # ---- operand prep (adj is NOT padded; only the small operands are) ------
    x_p = jnp.pad(x, ((0, n_sup_pad - n), (0, in_f_pad - in_f))).astype(cdt)
    w_p = jnp.pad(weight, ((0, in_f_pad - in_f), (0, out_f_pad - out_f))).astype(cdt)
    adj_c = adj if adj.dtype == cdt else adj.astype(cdt)

    # ---- kernel 1: support = X @ W ------------------------------------------
    t1 = min(1024, n_sup_pad)
    need1 = 2 * (t1 * in_f_pad + in_f_pad * out_f_pad + t1 * out_f_pad) * itm
    support = pl.pallas_call(
        _support_kernel,
        out_shape=jax.ShapeDtypeStruct((n_sup_pad, out_f_pad), cdt),
        grid=(_cdiv(n_sup_pad, t1),),
        in_specs=[
            pl.BlockSpec((t1, in_f_pad), lambda i: (i, 0)),
            pl.BlockSpec((in_f_pad, out_f_pad), lambda i: (0, 0)),
        ],
        out_specs=pl.BlockSpec((t1, out_f_pad), lambda i: (i, 0)),
        compiler_params=pltpu.CompilerParams(
            dimension_semantics=("parallel",),
            vmem_limit_bytes=_vmem_limit(need1),
        ),
        cost_estimate=pl.CostEstimate(
            flops=int(2 * n_sup_pad * in_f_pad * out_f_pad),
            transcendentals=0,
            bytes_accessed=int(
                (n_sup_pad * in_f_pad + in_f_pad * out_f_pad
                 + n_sup_pad * out_f_pad) * itm),
        ),
    )(x_p, w_p)

    # ---- kernel 2: out = adj @ support (+ bias) ------------------------------
    has_bias = bias is not None
    kernel2 = _make_aggregate_kernel(
        n=n, tk=tk, num_k=num_k, mask_tail=mask_tail,
        slice_support=slice_support, has_bias=has_bias)

    in_specs = [pl.BlockSpec((tm, tk), lambda i, k: (i, k))]
    operands = [adj_c, support]
    if support_resident:
        # Constant block index => support DMA'd into VMEM exactly once.
        in_specs.append(pl.BlockSpec((n_sup_pad, out_f_pad), lambda i, k: (0, 0)))
    else:
        in_specs.append(pl.BlockSpec((tk, out_f_pad), lambda i, k: (k, 0)))
    if has_bias:
        b_p = jnp.pad(bias.astype(jnp.float32).reshape(1, out_f),
                      ((0, 0), (0, out_f_pad - out_f)))
        in_specs.append(pl.BlockSpec((1, out_f_pad), lambda i, k: (0, 0)))
        operands.append(b_p)

    out_itm = jnp.dtype(out_dtype).itemsize
    sup_block_rows = n_sup_pad if support_resident else tk
    need2 = (2 * tm * tk * itm                       # adj tiles (double buffered)
             + 2 * sup_block_rows * out_f_pad * itm  # support block(s)
             + 2 * tm * out_f_pad * out_itm          # output tiles
             + tm * out_f_pad * 4                    # f32 accumulator
             + 2 * out_f_pad * 4)                    # bias

    out_full = pl.pallas_call(
        kernel2,
        out_shape=jax.ShapeDtypeStruct((n, out_f_pad), out_dtype),
        grid=(num_i, num_k),
        in_specs=in_specs,
        out_specs=pl.BlockSpec((tm, out_f_pad), lambda i, k: (i, 0)),
        scratch_shapes=[pltpu.VMEM((tm, out_f_pad), jnp.float32)],
        compiler_params=pltpu.CompilerParams(
            dimension_semantics=("parallel", "arbitrary"),
            vmem_limit_bytes=_vmem_limit(need2),
        ),
        cost_estimate=pl.CostEstimate(
            flops=int(2 * n * n * out_f_pad),
            transcendentals=0,
            bytes_accessed=int(
                n * n * itm
                + (1 if support_resident else num_i) * n_sup_pad * out_f_pad * itm
                + n * out_f_pad * out_itm
                + out_f_pad * 4),
        ),
    )(*operands)

    if out_f_pad != out_f:
        return out_full[:, :out_f]
    return out_full


if __name__ == "__main__":
    # Small, deterministic problem: 8 nodes, in_features=32, out_features=16.
    num_nodes, in_features, out_features = 8, 32, 16

    key = jax.random.PRNGKey(0)
    k_x, k_adj, k_w, k_b = jax.random.split(key, 4)

    x = jax.random.normal(k_x, (num_nodes, in_features), dtype=jnp.float32)

    # Symmetric, row-normalized adjacency (synthetic, deterministic).
    a_raw = (jax.random.uniform(k_adj, (num_nodes, num_nodes)) > 0.5).astype(jnp.float32)
    adj = a_raw + a_raw.T + jnp.eye(num_nodes, dtype=jnp.float32)
    deg = jnp.sum(adj, axis=1, keepdims=True)
    adj = adj / deg

    # Parameters: same init scheme as reset_parameters (uniform(-stdv, stdv)).
    stdv = 1.0 / math.sqrt(out_features)
    weight = jax.random.uniform(
        k_w, (in_features, out_features), minval=-stdv, maxval=stdv, dtype=jnp.float32
    )
    bias = jax.random.uniform(
        k_b, (out_features,), minval=-stdv, maxval=stdv, dtype=jnp.float32
    )

    # High-precision reference in plain JAX.
    hp = jax.lax.Precision.HIGHEST
    ref = jnp.dot(adj, jnp.dot(x, weight, precision=hp), precision=hp) + bias
    ref_nobias = jnp.dot(adj, jnp.dot(x, weight, precision=hp), precision=hp)

    # bf16 path (default, the fast one).
    out_bf16 = jax.block_until_ready(gcn_layer(x, adj, weight, bias))
    # f32 path (tight numerics).
    out_f32 = jax.block_until_ready(
        gcn_layer(x, adj, weight, bias, compute_dtype=jnp.float32))
    # no-bias kernel variant.
    out_nb = jax.block_until_ready(
        gcn_layer(x, adj, weight, None, compute_dtype=jnp.float32))

    assert out_bf16.shape == (num_nodes, out_features)
    assert out_f32.shape == (num_nodes, out_features)
    assert out_nb.shape == (num_nodes, out_features)

    assert jnp.allclose(out_f32, ref, atol=2e-3, rtol=2e-3), (
        float(jnp.max(jnp.abs(out_f32 - ref))))
    assert jnp.allclose(out_nb, ref_nobias, atol=2e-3, rtol=2e-3), (
        float(jnp.max(jnp.abs(out_nb - ref_nobias))))
    # bf16 operands with f32 accumulation -> looser tolerance.
    assert jnp.allclose(out_bf16, ref, atol=5e-2, rtol=5e-2), (
        float(jnp.max(jnp.abs(out_bf16 - ref))))

    print("KERNEL_OK")
</pallas_src>

<mosaic_0001>
module attributes {stable_mosaic.version = 11 : i64} {
  func.func @_support_kernel(%arg0: i32, %arg1: memref<8x128xbf16, #tpu.memory_space<vmem>>, %arg2: memref<128x128xbf16, #tpu.memory_space<vmem>>, %arg3: memref<8x128xbf16, #tpu.memory_space<vmem>>) attributes {dimension_semantics = [#tpu.dimension_semantics<parallel>], iteration_bounds = array<i64: 1>, scalar_prefetch = 0 : i64, scratch_operands = 0 : i64, tpu.core_type = #tpu.core_type<tc>, window_params = [{transform_indices = @transform_0, window_bounds = array<i64: 8, 128>}, {pipeline_mode = #tpu.pipeline_mode<synchronous>, transform_indices = @transform_1, window_bounds = array<i64: 128, 128>}, {transform_indices = @transform_2, window_bounds = array<i64: 8, 128>}]} {
    %c0 = arith.constant 0 : index
    %c0_0 = arith.constant 0 : index
    %0 = vector.load %arg1[%c0, %c0_0] : memref<8x128xbf16, #tpu.memory_space<vmem>>, vector<8x128xbf16>
    %c0_1 = arith.constant 0 : index
    %c0_2 = arith.constant 0 : index
    %1 = vector.load %arg2[%c0_1, %c0_2] : memref<128x128xbf16, #tpu.memory_space<vmem>>, vector<128x128xbf16>
    %cst = arith.constant dense<0.000000e+00> : vector<8x128xf32>
    %2 = tpu.matmul %0, %1, %cst {dimension_numbers = #tpu.dot_dimension_numbers<[1], [0], [0], [1], [0, 0, 1, 1], [], []>} : vector<8x128xbf16>, vector<128x128xbf16>, vector<8x128xf32> -> vector<8x128xf32>
    %3 = arith.truncf %2 : vector<8x128xf32> to vector<8x128xbf16>
    %c0_3 = arith.constant 0 : index
    %c0_4 = arith.constant 0 : index
    %4 = vector.load %arg3[%c0_3, %c0_4] : memref<8x128xbf16, #tpu.memory_space<vmem>>, vector<8x128xbf16>
    tpu.vector_store %arg3[%c0_3, %c0_4], %3 {strides = array<i32>} : memref<8x128xbf16, #tpu.memory_space<vmem>>, vector<8x128xbf16>,
    return
  }
  func.func @transform_0(%arg0: i32) -> (i32, i32) {
    %c0_i32 = arith.constant 0 : i32
    %c0_i32_0 = arith.constant 0 : i32
    return %arg0, %c0_i32 : i32, i32
  }
  func.func @transform_1(%arg0: i32) -> (i32, i32) {
    %c0_i32 = arith.constant 0 : i32
    %c0_i32_0 = arith.constant 0 : i32
    %c0_i32_1 = arith.constant 0 : i32
    return %c0_i32, %c0_i32_0 : i32, i32
  }
  func.func @transform_2(%arg0: i32) -> (i32, i32) {
    %c0_i32 = arith.constant 0 : i32
    %c0_i32_0 = arith.constant 0 : i32
    return %arg0, %c0_i32 : i32, i32
  }
}

</mosaic_0001>

<bundles_post_ra>
// kernel: tpu_custom_call.1
= control target key start
LH: loop header
LB: loop body
LE: loop exit
PB: predicated region body
PF: predicated region fallthrough
CT: control target
= control target key end

     0   :  { %7 = vsyncpa [#allocation3], 0  ;;  %s311_s0 = inlined_call_operand.hbm [shape: bf16[8,128], index: 0, kind: input, shape index: {}]   ;;  %s312_s1 = inlined_call_operand.hbm [shape: bf16[128,128], index: 1, kind: input, shape index: {}]   ;;  %s313_s2 = inlined_call_operand.hbm [shape: bf16[8,128], index: 2, kind: output, shape index: {}]  }
   0x1   :  { %8 = vsyncpa [#allocation6], 0 }
   0x2   :  { %9 = vsyncpa [#allocation4], 0  ;;  %s280_s9 = smov [#allocation2]   ;;  %s281_s11 = smov [#allocation5]  }
   0x3   :  { %s16_s10 = sshll.u32 %s280_s9, 4  ;;  %s25_s12 = sshll.u32 %s281_s11, 4  ;;  %s17_s10 = int_to_ptr.vmem [resolvable:$true] %s16_s10  ;;  %s26_s12 = int_to_ptr.vmem [resolvable:$true] %s25_s12 }
   0x4   :  { %s222_s13 = scalar_lea.vmem %s17_s10, 64  ;;  %p227_p1 = scmp.lt.s32.totalorder %s17_s10, %s17_s10 }
   0x5   :  { %p223_p0 = scmp.ne.s32.totalorder %s17_s10, %s222_s13  ;;  %p228_p2 = scmp.lt.s32.totalorder %s222_s13, %s222_s13 }
   0x7   :  { %p229_p3 = por %p228_p2, %p227_p1 }
   0x9   :  { %p230_p4 = pnand %p229_p3, %p223_p0 }
   0xb   :  { %233 = shalt.err (!%p230_p4)
}
   0xc   :  { %19 = dma.hbm_to_vmem [thread:$0]  %s311_s0, 64, %s17_s10, [#allocation3]  }
   0xd   :  { %s242_s16 = scalar_lea.vmem %s26_s12, 1024  ;;  %p247_p6 = scmp.lt.s32.totalorder %s26_s12, %s26_s12 }
   0xe   :  { %p243_p5 = scmp.ne.s32.totalorder %s26_s12, %s242_s16  ;;  %p248_p7 = scmp.lt.s32.totalorder %s242_s16, %s242_s16 }
  0x10   :  { %p249_p8 = por %p248_p7, %p247_p6 }
  0x12   :  { %p250_p9 = pnand %p249_p8, %p243_p5 }
  0x14   :  { %253 = shalt.err (!%p250_p9)
}
  0x15   :  { %s282_s17 = smov 64   ;;  %s283_s18 = smov 4  }
  0x16   :  { %31 = dma.hbm_to_vmem [thread:$0]  %s312_s1, 1024, %s26_s12, [#allocation6], %s282_s17, %s282_s17, %s283_s18  }
  0x17   :  { %274 = dma.done.wait [#allocation3], 64  }
  0x18   :  { %275 = vsyncadd [#allocation3], 4294967232 }
  0x19   :  { %276 = dma.done.wait [#allocation6], 1024  }
  0x1a   :  { %277 = vsyncadd [#allocation6], 4294966272  ;;  %v284_v0 = vmov 0.0   ;;  %vm285_vm0 = vmmov 0   ;;  %v206_v1 = vld [vmem:[#allocation5 + $0x38] sm:$0xff]   ;;  %v207_v2 = vld [vmem:[#allocation5 + $0x30] sm:$0xff]  }
  0x1b   :  { %179 = vmatprep.subr.bf16.mxu0 %v284_v0  ;;  %195 = vmatprep.mubr.msk.bf16.mxu0 %vm285_vm0, %v284_v0  ;;  %v208_v3 = vld [vmem:[#allocation5 + $0x28] sm:$0xff]   ;;  %v209_v4 = vld [vmem:[#allocation5 + $0x20] sm:$0xff]   ;;  %v210_v5 = vld [vmem:[#allocation5 + $0x18] sm:$0xff]   ;;  %s286_s0 = smov [#allocation7]  }
  0x1c   :  { %180 = vmatpush3.bf16.msra.mxu0 %v206_v1  ;;  %v211_v6 = vld [vmem:[#allocation5 + $0x10] sm:$0xff]   ;;  %v212_v7 = vld [vmem:[#allocation5 + $0x8] sm:$0xff]   ;;  %v213_v8 = vld [vmem:[#allocation5] sm:$0xff]   ;;  %s152_s1 = sshll.u32 %s286_s0, 4  ;;  %s153_s1 = int_to_ptr.vmem [resolvable:$true] %s152_s1 }
  0x1d   :  { %181 = vmatprep.subr.bf16.mxu0 %v284_v0  ;;  %v39_v9 = vld [vmem:[#allocation2] sm:$0xf]  ;;  %s254_s21 = scalar_lea.vmem %s153_s1, 64  ;;  %p259_p11 = scmp.lt.s32.totalorder %s153_s1, %s153_s1 }
  0x1e   :  { %p255_p10 = scmp.ne.s32.totalorder %s153_s1, %s254_s21  ;;  %p260_p12 = scmp.lt.s32.totalorder %s254_s21, %s254_s21 }
  0x20   :  { %182 = vmatpush3.bf16.msra.mxu0 %v207_v2  ;;  %p261_p13 = por %p260_p12, %p259_p11 }
  0x21   :  { %183 = vmatprep.subr.bf16.mxu0 %v284_v0 }
  0x22   :  { %p262_p0 = pnand %p261_p13, %p255_p10 }
  0x24   :  { %184 = vmatpush3.bf16.msra.mxu0 %v208_v3 }
  0x25   :  { %185 = vmatprep.subr.bf16.mxu0 %v284_v0 }
  0x28   :  { %186 = vmatpush3.bf16.msra.mxu0 %v209_v4 }
  0x29   :  { %187 = vmatprep.subr.bf16.mxu0 %v284_v0 }
  0x2c   :  { %188 = vmatpush3.bf16.msra.mxu0 %v210_v5 }
  0x2d   :  { %189 = vmatprep.subr.bf16.mxu0 %v284_v0 }
  0x30   :  { %190 = vmatpush3.bf16.msra.mxu0 %v211_v6 }
  0x31   :  { %191 = vmatprep.subr.bf16.mxu0 %v284_v0 }
  0x34   :  { %192 = vmatpush3.bf16.msra.mxu0 %v212_v7 }
  0x35   :  { %193 = vmatprep.subr.bf16.mxu0 %v284_v0 }
  0x38   :  { %194 = vmatpush3.bf16.msra.mxu0 %v213_v8 }
  0x3b   :  { %196 = vmatmul.mubr.bf16.vlgmr.msra.gmra.mxu0 %v39_v9 }
  0xfb   :  { %v138_v10 = vpop.f32.mrf.mxu0 }
  0xfc   :  { %v144_v11 = vpack.c.bf16 %v138_v10, %v138_v10 }
  0xfd   :  { %v197_v12 = vpop.f32.mrf.mxu0 }
  0xfe   :  { %145 = vst [vmem:[#allocation7] sm:$0xf] %v144_v11 }
  0xff   :  { %v141_v13 = vpop.f32.mrf.mxu0 }
 0x100   :  { %265 = shalt.err (!%p262_p0)
}
 0x101   :  { %155 = dma.vmem_to_hbm [thread:$0]  %s153_s1, 64, %s313_s2, [#allocation4]   ;;  %v198_v14 = vpop.f32.mrf.mxu0 }
 0x102   :  { %278 = dma.done.wait [#allocation4], 64  }
 0x103   :  { %279 = vsyncadd [#allocation4], 4294967232 }
 0x104   :  { %159 = vsyncpa [#allocation3], 1 }
 0x105   :  { %160 = vsyncpa [#allocation6], 1 }
 0x106   :  { %161 = vsyncpa [#allocation4], 1 }

</bundles_post_ra>
